<compile_context>
chip_gen: v7x
topology: tpu7x:2x2x1
jax: 0.10.0
libtpu: 0.0.40
codegen_flags: <defaults>
</compile_context>

<pallas_src>
import math

import jax
import jax.numpy as jnp
from jax.experimental import pallas as pl
from jax.experimental.pallas import tpu as pltpu


def _make_fcnet_kernel(fan_outs):
    """Kernel over one (batch, pixel-tile) block.

    Refs:
      x_ref  : (in_chn, tile_n)        concatenated rgb/xy, pixels on lanes
      w0_ref : (width, in_chn)         layer-0 weight (pre-transposed)
      wt_ref : (sum fan_out, width)    all tail-layer weights packed (rows)
      b_ref  : (sum fan_out, 1)        all biases packed (f32)
      o_ref  : (out_chn, tile_n)
    """
    num_layers = len(fan_outs)

    def kernel(x_ref, w0_ref, wt_ref, b_ref, o_ref):
        # Layer 0: single K=in_chn dot (rgb/xy concat fused in the wrapper).
        h = jnp.dot(w0_ref[...], x_ref[...],
                    preferred_element_type=jnp.float32)
        h = h + b_ref[0:fan_outs[0], :]          # f32 bias add

        w_off = 0
        b_off = fan_outs[0]
        for layer in range(1, num_layers):
            h = jnp.maximum(h, 0.0)              # ReLU in f32 (VPU, free filler)
            fo = fan_outs[layer]
            w = wt_ref[w_off:w_off + fo, :]      # static slice -> free ref view
            # cast activations back to storage dtype only right before the dot
            h = jnp.dot(w, h.astype(w.dtype),
                        preferred_element_type=jnp.float32)
            h = h + b_ref[b_off:b_off + fo, :]
            w_off += fo
            b_off += fo

        o_ref[...] = h.astype(o_ref.dtype)

    return kernel


def fcnet_forward(image, grid, params, *, in_type="rgbxy", tile_n=8192,
                  compute_dtype=jnp.bfloat16, out_dtype=None,
                  vmem_limit_bytes=48 * 1024 * 1024):
    """Fused FCNet forward pass.

    image: (B, 3, H, W) NCHW; grid: (B, 2, H, W) NCHW.
    params: list of (W, b) with W: (fan_in, fan_out), b: (1, fan_out)
            (PyTorch nn.Linear layout).
    Returns NCHW output (B, out_chn, H, W); the PyTorch module's row layout is
    recovered (if ever needed) by out.transpose(0, 2, 3, 1).reshape(-1, out_chn).
    """
    if in_type == "rgb":
        feats = [image]
    elif in_type == "xy":
        feats = [grid]
    elif in_type == "rgbxy":
        feats = [image, grid]
    else:
        raise ValueError(f"unknown in_type: {in_type}")

    B, _, H, W = feats[0].shape
    HW = H * W
    if out_dtype is None:
        out_dtype = feats[0].dtype

    # ---- inputs: flatten spatial dims; fuse rgb/xy concat with the bf16 cast
    # (one XLA fusion, no transpose) so layer 0 is a single K=in_chn dot. -----
    xs = [f.reshape(B, f.shape[1], HW) for f in feats]
    x_cat = xs[0] if len(xs) == 1 else jnp.concatenate(xs, axis=1)
    x_cat = x_cat.astype(compute_dtype)                       # (B, in_chn, HW)
    in_chn = x_cat.shape[1]

    num_layers = len(params)
    assert num_layers >= 2, "FCNet always has at least 2 Linear layers"
    assert params[0][0].shape[0] == in_chn, "first-layer fan_in mismatch"
    width = params[0][0].shape[1]
    fan_outs = tuple(int(w.shape[1]) for (w, _) in params)
    for (w, _) in params[1:]:
        assert w.shape[0] == width, "tail layers must share fan_in=width"
    out_chn = fan_outs[-1]

    # ---- weights: pre-transpose to (fan_out, fan_in), pack tail layers ------
    w0_t = params[0][0].T.astype(compute_dtype)               # (width, in_chn)
    w_tail = jnp.concatenate([w.T for (w, _) in params[1:]], axis=0
                             ).astype(compute_dtype)          # (sum fo, width)
    b_all = jnp.concatenate([b.reshape(-1) for (_, b) in params]
                            ).reshape(-1, 1).astype(jnp.float32)  # (sum fo, 1)

    # ---- tiling: pixels on the lane axis, big 128-aligned tiles -------------
    tile_n = max(128, (int(tile_n) // 128) * 128)
    if B == 1 and HW > 256:
        # v7x shards the "parallel" grid axes across its 2 TensorCores; make
        # sure a single-image call still produces >= 2 pixel tiles.
        half = ((pl.cdiv(HW, 2) + 127) // 128) * 128
        tile_n = min(tile_n, max(128, half))
    if tile_n >= HW:
        tile_n = HW                                  # full-extent lane block
    grid_j = pl.cdiv(HW, tile_n)                     # partial tail block masked
    pgrid = (B, grid_j)

    # ---- BlockSpecs ----------------------------------------------------------
    in_specs = [
        pl.BlockSpec((None, in_chn, tile_n), lambda bi, j: (bi, 0, j)),
        pl.BlockSpec(w0_t.shape, lambda bi, j: (0, 0)),
        pl.BlockSpec(w_tail.shape, lambda bi, j: (0, 0)),
        pl.BlockSpec(b_all.shape, lambda bi, j: (0, 0)),
    ]
    out_specs = pl.BlockSpec((None, out_chn, tile_n), lambda bi, j: (bi, 0, j))

    # ---- advisory cost estimate ----------------------------------------------
    layer_dims = [in_chn] + list(fan_outs)
    flops = 2 * B * HW * sum(layer_dims[i] * layer_dims[i + 1]
                             for i in range(num_layers))
    bytes_accessed = int(
        x_cat.size * x_cat.dtype.itemsize
        + B * HW * out_chn * jnp.dtype(out_dtype).itemsize
        + w0_t.size * w0_t.dtype.itemsize
        + w_tail.size * w_tail.dtype.itemsize
        + b_all.size * b_all.dtype.itemsize)
    cost = pl.CostEstimate(flops=flops, transcendentals=0,
                           bytes_accessed=bytes_accessed)

    out = pl.pallas_call(
        _make_fcnet_kernel(fan_outs),
        out_shape=jax.ShapeDtypeStruct((B, out_chn, HW), out_dtype),
        grid_spec=pltpu.PrefetchScalarGridSpec(
            num_scalar_prefetch=0,
            grid=pgrid,
            in_specs=in_specs,
            out_specs=out_specs),
        compiler_params=pltpu.CompilerParams(
            dimension_semantics=("parallel", "parallel"),
            vmem_limit_bytes=vmem_limit_bytes),
        cost_estimate=cost,
    )(x_cat, w0_t, w_tail, b_all)

    return out.reshape(B, out_chn, H, W)


def init_fcnet_params(key, in_chn, out_chn, width, depth, dtype=jnp.float32):
    """Deterministic params matching FCNet's layer shapes (PyTorch layout)."""
    dims = [in_chn] + [width] * (depth + 1) + [out_chn]
    params = []
    for i in range(len(dims) - 1):
        key, kw, kb = jax.random.split(key, 3)
        fan_in, fan_out = dims[i], dims[i + 1]
        bound = 1.0 / math.sqrt(fan_in)
        w = jax.random.uniform(kw, (fan_in, fan_out), dtype, -bound, bound)
        b = jax.random.uniform(kb, (1, fan_out), dtype, -bound, bound)
        params.append((w, b))
    return params


def fcnet_reference(image, grid, params, in_type):
    """Pure-JAX f32 reference matching the PyTorch module (returned as NCHW)."""
    def rows(x):  # NCHW -> (B*H*W, C)
        return jnp.transpose(x, (0, 2, 3, 1)).reshape(-1, x.shape[1])

    if in_type == "rgb":
        h = rows(image)
    elif in_type == "xy":
        h = rows(grid)
    else:
        h = jnp.concatenate([rows(image), rows(grid)], axis=-1)

    for i, (w, b) in enumerate(params):
        h = h @ w + b
        if i < len(params) - 1:
            h = jnp.maximum(h, 0.0)

    B, _, H, W = (grid.shape if in_type == "xy" else image.shape)
    out_chn = params[-1][0].shape[1]
    return jnp.transpose(h.reshape(B, H, W, out_chn), (0, 3, 1, 2))


if __name__ == "__main__":
    # Small config: rgbxy input -> in_chn = 3 + 2 = 5, width=32, depth=2, out_chn=3.
    B, H, W = 2, 16, 16
    in_type = "rgbxy"
    in_chn, out_chn, width, depth = 5, 3, 32, 2

    key = jax.random.PRNGKey(0)
    k_img, k_grid, k_params = jax.random.split(key, 3)

    image = jax.random.normal(k_img, (B, 3, H, W), jnp.float32)   # NCHW
    grid = jax.random.normal(k_grid, (B, 2, H, W), jnp.float32)   # NCHW
    params = init_fcnet_params(k_params, in_chn, out_chn, width, depth)

    ref = fcnet_reference(image, grid, params, in_type)

    # bf16 storage / f32 accumulation (production path) — bf16-level tolerance.
    out_bf16 = fcnet_forward(image, grid, params, in_type=in_type)
    out_bf16 = jax.block_until_ready(out_bf16)
    assert out_bf16.shape == (B, out_chn, H, W)
    assert jnp.allclose(out_bf16, ref, atol=5e-2, rtol=5e-2), \
        float(jnp.max(jnp.abs(out_bf16 - ref)))

    # f32 storage path — tight tolerance against the reference.
    out_f32 = fcnet_forward(image, grid, params, in_type=in_type,
                            compute_dtype=jnp.float32)
    out_f32 = jax.block_until_ready(out_f32)
    assert jnp.allclose(out_f32, ref, atol=1e-4, rtol=1e-4), \
        float(jnp.max(jnp.abs(out_f32 - ref)))

    print("KERNEL_OK")
</pallas_src>

<mosaic_0001>
module attributes {stable_mosaic.version = 11 : i64} {
  func.func @kernel(%arg0: i32, %arg1: i32, %arg2: memref<1x5x256xbf16, #tpu.memory_space<vmem>>, %arg3: memref<32x5xbf16, #tpu.memory_space<vmem>>, %arg4: memref<67x32xbf16, #tpu.memory_space<vmem>>, %arg5: memref<99x1xf32, #tpu.memory_space<vmem>>, %arg6: memref<1x3x256xf32, #tpu.memory_space<vmem>>) attributes {dimension_semantics = [#tpu.dimension_semantics<parallel>, #tpu.dimension_semantics<parallel>], iteration_bounds = array<i64: 2, 1>, scalar_prefetch = 0 : i64, scratch_operands = 0 : i64, tpu.core_type = #tpu.core_type<tc>, window_params = [{transform_indices = @transform_0, window_bounds = array<i64: 1, 5, 256>}, {pipeline_mode = #tpu.pipeline_mode<synchronous>, transform_indices = @transform_1, window_bounds = array<i64: 32, 5>}, {pipeline_mode = #tpu.pipeline_mode<synchronous>, transform_indices = @transform_2, window_bounds = array<i64: 67, 32>}, {pipeline_mode = #tpu.pipeline_mode<synchronous>, transform_indices = @transform_3, window_bounds = array<i64: 99, 1>}, {transform_indices = @transform_4, window_bounds = array<i64: 1, 3, 256>}]} {
    %c0 = arith.constant 0 : index
    %c0_0 = arith.constant 0 : index
    %0 = vector.load %arg3[%c0, %c0_0] : memref<32x5xbf16, #tpu.memory_space<vmem>>, vector<32x5xbf16>
    %c0_1 = arith.constant 0 : index
    %c0_2 = arith.constant 0 : index
    %c0_3 = arith.constant 0 : index
    %1 = vector.load %arg2[%c0_1, %c0_2, %c0_3] : memref<1x5x256xbf16, #tpu.memory_space<vmem>>, vector<1x5x256xbf16>
    %2 = vector.shape_cast %1 : vector<1x5x256xbf16> to vector<5x256xbf16>
    %cst = arith.constant dense<0.000000e+00> : vector<32x256xf32>
    %3 = tpu.matmul %0, %2, %cst {dimension_numbers = #tpu.dot_dimension_numbers<[1], [0], [0], [1], [0, 0, 1, 1], [], []>} : vector<32x5xbf16>, vector<5x256xbf16>, vector<32x256xf32> -> vector<32x256xf32>
    %c0_4 = arith.constant 0 : index
    %c0_5 = arith.constant 0 : index
    %4 = vector.load %arg5[%c0_4, %c0_5] : memref<99x1xf32, #tpu.memory_space<vmem>>, vector<32x1xf32>
    %5 = vector.broadcast %4 : vector<32x1xf32> to vector<32x256xf32>
    %6 = arith.addf %3, %5 : vector<32x256xf32>
    %cst_6 = arith.constant 0.000000e+00 : f32
    %7 = vector.broadcast %cst_6 : f32 to vector<32x256xf32>
    %8 = arith.maximumf %6, %7 : vector<32x256xf32>
    %c0_7 = arith.constant 0 : index
    %c0_8 = arith.constant 0 : index
    %9 = vector.load %arg4[%c0_7, %c0_8] : memref<67x32xbf16, #tpu.memory_space<vmem>>, vector<32x32xbf16>
    %10 = arith.truncf %8 : vector<32x256xf32> to vector<32x256xbf16>
    %cst_9 = arith.constant dense<0.000000e+00> : vector<32x256xf32>
    %11 = tpu.matmul %9, %10, %cst_9 {dimension_numbers = #tpu.dot_dimension_numbers<[1], [0], [0], [1], [0, 0, 1, 1], [], []>} : vector<32x32xbf16>, vector<32x256xbf16>, vector<32x256xf32> -> vector<32x256xf32>
    %c32 = arith.constant 32 : index
    %c0_10 = arith.constant 0 : index
    %12 = vector.load %arg5[%c32, %c0_10] : memref<99x1xf32, #tpu.memory_space<vmem>>, vector<32x1xf32>
    %13 = vector.broadcast %12 : vector<32x1xf32> to vector<32x256xf32>
    %14 = arith.addf %11, %13 : vector<32x256xf32>
    %cst_11 = arith.constant 0.000000e+00 : f32
    %15 = vector.broadcast %cst_11 : f32 to vector<32x256xf32>
    %16 = arith.maximumf %14, %15 : vector<32x256xf32>
    %c32_12 = arith.constant 32 : index
    %c0_13 = arith.constant 0 : index
    %17 = vector.load %arg4[%c32_12, %c0_13] : memref<67x32xbf16, #tpu.memory_space<vmem>>, vector<32x32xbf16>
    %18 = arith.truncf %16 : vector<32x256xf32> to vector<32x256xbf16>
    %cst_14 = arith.constant dense<0.000000e+00> : vector<32x256xf32>
    %19 = tpu.matmul %17, %18, %cst_14 {dimension_numbers = #tpu.dot_dimension_numbers<[1], [0], [0], [1], [0, 0, 1, 1], [], []>} : vector<32x32xbf16>, vector<32x256xbf16>, vector<32x256xf32> -> vector<32x256xf32>
    %c64 = arith.constant 64 : index
    %c0_15 = arith.constant 0 : index
    %20 = vector.load %arg5[%c64, %c0_15] : memref<99x1xf32, #tpu.memory_space<vmem>>, vector<32x1xf32>
    %21 = vector.broadcast %20 : vector<32x1xf32> to vector<32x256xf32>
    %22 = arith.addf %19, %21 : vector<32x256xf32>
    %cst_16 = arith.constant 0.000000e+00 : f32
    %23 = vector.broadcast %cst_16 : f32 to vector<32x256xf32>
    %24 = arith.maximumf %22, %23 : vector<32x256xf32>
    %c64_17 = arith.constant 64 : index
    %c0_18 = arith.constant 0 : index
    %25 = vector.load %arg4[%c64_17, %c0_18] : memref<67x32xbf16, #tpu.memory_space<vmem>>, vector<3x32xbf16>
    %26 = arith.truncf %24 : vector<32x256xf32> to vector<32x256xbf16>
    %cst_19 = arith.constant dense<0.000000e+00> : vector<3x256xf32>
    %27 = tpu.matmul %25, %26, %cst_19 {dimension_numbers = #tpu.dot_dimension_numbers<[1], [0], [0], [1], [0, 0, 1, 1], [], []>} : vector<3x32xbf16>, vector<32x256xbf16>, vector<3x256xf32> -> vector<3x256xf32>
    %c96 = arith.constant 96 : index
    %c0_20 = arith.constant 0 : index
    %28 = vector.load %arg5[%c96, %c0_20] : memref<99x1xf32, #tpu.memory_space<vmem>>, vector<3x1xf32>
    %29 = vector.broadcast %28 : vector<3x1xf32> to vector<3x256xf32>
    %30 = arith.addf %27, %29 : vector<3x256xf32>
    %c0_21 = arith.constant 0 : index
    %c0_22 = arith.constant 0 : index
    %c0_23 = arith.constant 0 : index
    %31 = vector.load %arg6[%c0_21, %c0_22, %c0_23] : memref<1x3x256xf32, #tpu.memory_space<vmem>>, vector<1x3x256xf32>
    %32 = vector.shape_cast %31 : vector<1x3x256xf32> to vector<3x256xf32>
    %33 = vector.shape_cast %30 : vector<3x256xf32> to vector<1x3x256xf32>
    tpu.vector_store %arg6[%c0_21, %c0_22, %c0_23], %33 {strides = array<i32>} : memref<1x3x256xf32, #tpu.memory_space<vmem>>, vector<1x3x256xf32>,
    return
  }
  func.func @transform_0(%arg0: i32, %arg1: i32) -> (i32, i32, i32) {
    %c0_i32 = arith.constant 0 : i32
    %c0_i32_0 = arith.constant 0 : i32
    return %arg0, %c0_i32, %arg1 : i32, i32, i32
  }
  func.func @transform_1(%arg0: i32, %arg1: i32) -> (i32, i32) {
    %c0_i32 = arith.constant 0 : i32
    %c0_i32_0 = arith.constant 0 : i32
    %c0_i32_1 = arith.constant 0 : i32
    return %c0_i32, %c0_i32_0 : i32, i32
  }
  func.func @transform_2(%arg0: i32, %arg1: i32) -> (i32, i32) {
    %c0_i32 = arith.constant 0 : i32
    %c0_i32_0 = arith.constant 0 : i32
    %c0_i32_1 = arith.constant 0 : i32
    return %c0_i32, %c0_i32_0 : i32, i32
  }
  func.func @transform_3(%arg0: i32, %arg1: i32) -> (i32, i32) {
    %c0_i32 = arith.constant 0 : i32
    %c0_i32_0 = arith.constant 0 : i32
    %c0_i32_1 = arith.constant 0 : i32
    return %c0_i32, %c0_i32_0 : i32, i32
  }
  func.func @transform_4(%arg0: i32, %arg1: i32) -> (i32, i32, i32) {
    %c0_i32 = arith.constant 0 : i32
    %c0_i32_0 = arith.constant 0 : i32
    return %arg0, %c0_i32, %arg1 : i32, i32, i32
  }
}

</mosaic_0001>

<bundles_post_ra>
// kernel: tpu_custom_call.1
= control target key start
LH: loop header
LB: loop body
LE: loop exit
PB: predicated region body
PF: predicated region fallthrough
CT: control target
= control target key end

     0   :  { %s841_s15 = smov 0   ;;  %s843_s16 = smov 0   ;;  %s957_s0 = inlined_call_operand.vmem [shape: bf16[2,5,256], index: 0, kind: input, shape index: {}]   ;;  %s958_s1 = inlined_call_operand.vmem [shape: bf16[32,5], index: 1, kind: input, shape index: {}]   ;;  %s959_s2 = inlined_call_operand.vmem [shape: bf16[67,32], index: 2, kind: input, shape index: {}]   ;;  %s960_s3 = inlined_call_operand.vmem [shape: f32[99,1], index: 3, kind: input, shape index: {}]   ;;  %s961_s4 = inlined_call_operand.vmem [shape: f32[2,3,256], index: 4, kind: output, shape index: {}]  }
   0x1   :  { %s845_s17 = smov 0  }
   0x2 LB: > { %s26_s18 = sadd.s32 1, %s808_s16  ;;  %p730_p0 = scmp.ge.s32.totalorder %s812_s17, 1  ;;  %s812_s17 = sphi %s845_s17, %s14_s17   ;;  %s808_s16 = sphi %s843_s16, %s963_s16   ;;  %s804_s15 = sphi %s841_s15, %s962_s15  }
   0x3   : > { %p28_p1 = scmp.ge.s32.totalorder %s26_s18, 2  ;;  %p183_p2 = scmp.lt.s32.totalorder %s812_s17, 3 }
   0x5   : > { %s965_s18 = smov (%p28_p1, %s26_s18), 0  ;;  %p184_p3 = pnand %p730_p0, %p183_p2 }
   0x6   : > { %p218_p4 = scmp.lt.s32.totalorder (!%p184_p3), %s804_s15, 1  ;;  %vm289_vm0 = vcmask (!%p184_p3), 1041408   ;;  %v814_v0 = vmov (!%p184_p3), 0   ;;  %vm290_vm1 = vcmask (!%p184_p3), 1042432   ;;  %v815_v1 = vmov (!%p184_p3), 65535   ;;  %v243_v3 = vld [vmem:[%s960_s3] sm:$0xff] (!%p184_p3) }
   0x7   : > { %187 = sbr.rel (%p184_p3) target bundleno = 943 (0x3af), region = 36  ;;  %331 = vmatprep.mubr.bf16.mxu0 (!%p184_p3), %v814_v0  ;;  %780 = vset.pattern.permute.xlu0 (!%p184_p3), %v814_v0  ;;  %v291_v2 = vsel (!%p184_p3), %vm289_vm0, 4294967295, %v815_v1  ;;  %v245_v4 = vld [vmem:[%s960_s3 + $0x10] sm:$0xff] (!%p184_p3)  ;;  %v244_v5 = vld [vmem:[%s960_s3 + $0x8] sm:$0xff] (!%p184_p3)  ;;  %v246_v8 = vld [vmem:[%s960_s3 + $0x18] sm:$0xff] (!%p184_p3)  ;;  %vm282_vm2 = vcmask (!%p184_p3), 39936  }
   0x8   : > { %781 = vset.pattern.permute.xlu1 (!%p184_p3), %v814_v0  ;;  %441 = vmatprep.mubr.bf16.mxu1 (!%p184_p3), %v814_v0  ;;  %v292_v7 = vsel (!%p184_p3), %vm290_vm1, %v291_v2, 0  ;;  %v368_v11 = vld [vmem:[%s960_s3 + $0x20] sm:$0xff] (!%p184_p3)  ;;  %v369_v14 = vld [vmem:[%s960_s3 + $0x28] sm:$0xff] (!%p184_p3)  ;;  %v370_v16 = vld [vmem:[%s960_s3 + $0x30] sm:$0xff] (!%p184_p3)  ;;  %vm402_vm3 = vcmask (!%p184_p3), 261120  }
   0x9   : > { %249 = vperm.xlu0 (!%p184_p3), %780, %v243_v3   ;;  %259 = vperm.xlu1 (!%p184_p3), %781, %v245_v4   ;;  %v784_v15 = vld [vmem:[%s958_s1] sm:$0xff] (!%p184_p3)   ;;  %v371_v17 = vld [vmem:[%s960_s3 + $0x38] sm:$0xff] (!%p184_p3)  ;;  %v479_v19 = vld [vmem:[%s960_s3 + $0x48] sm:$0xff] (!%p184_p3) }
   0xa   : > { %v478_v18 = vld [vmem:[%s960_s3 + $0x40] sm:$0xff] (!%p184_p3)  ;;  %v785_v20 = vld [vmem:[%s958_s1 + $0x8] sm:$0xff] (!%p184_p3)   ;;  %v480_v21 = vld [vmem:[%s960_s3 + $0x50] sm:$0xff] (!%p184_p3) }
   0xb   : > { %v481_v22 = vld [vmem:[%s960_s3 + $0x58] sm:$0xff] (!%p184_p3)  ;;  %v584_v23 = vld [vmem:[%s960_s3 + $0x60] sm:$0x7] (!%p184_p3)  ;;  %v787_v57 = vld [vmem:[%s959_s2 + $0x8] sm:$0xff] (!%p184_p3)  }
   0xc   : > { %v786_v56 = vld [vmem:[%s959_s2] sm:$0xff] (!%p184_p3)  }
   0xd   : > { %254 = vperm.xlu0 (!%p184_p3), %780, %v244_v5   ;;  %264 = vperm.xlu1 (!%p184_p3), %781, %v246_v8  }
   0xe   : > { %s967_s15 = smov (!%p218_p4, %s804_s15), 1 }
   0xf   : > { %s752_s21 = sshll.u32 %s967_s15, 3 }
  0x10   : > { %s225_s26 = scalar_lea.vmem %s957_s0, %s752_s21  ;;  %s235_s23 = scalar_lea.vmem %s961_s4, %s752_s21 }
  0x11   : > { %v242_v6 = vld [vmem:[%s225_s26] sm:$0x77]  ;;  %374 = vperm.xlu0 %780, %v368_v11   ;;  %379 = vperm.xlu1 %781, %v369_v14  }
  0x12   : > { %v738_v9 = vcombine.high %v242_v6, %v242_v6  ;;  %v737_v10 = vcombine.low %v242_v6, %v242_v6 }
  0x14   : > { %v297_v12 = vand.u32 %v738_v9, %v292_v7  ;;  %v294_v13 = vand.u32 %v737_v10, %v292_v7 }
  0x15   : > { %384 = vperm.xlu0 %780, %v370_v16   ;;  %389 = vperm.xlu1 %781, %v371_v17  }
  0x16   : > { %299 = vmatprep.subr.bf16.mxu0 %v297_v12 }
  0x17   : > { %300 = vmatpush1.bf16.msra.mxu0 %v294_v13 }
  0x19   : > { %484 = vperm.xlu0 %780, %v478_v18   ;;  %489 = vperm.xlu1 %781, %v479_v19  }
  0x1a   : > { %739 = vmatmul.mubr.msk.bf16.vlgmr.msra.gmra.mrb[0].mxu0 %vm282_vm2, %v784_v15 }
  0x1b   : > { %341 = vmatprep.mubr.bf16.mxu0 %v814_v0 }
  0x1d   : > { %494 = vperm.xlu0 %780, %v480_v21   ;;  %499 = vperm.xlu1 %781, %v481_v22  }
  0x21   : > { %587 = vperm.xlu0 %780, %v584_v23  }
  0x22   : > { %740 = vmatmul.mubr.msk.bf16.gmra.mrb[4].mxu0 %vm282_vm2, %v785_v20 }
  0x23   : > { %550 = vmatprep.mubr.bf16.mxu0 %v814_v0 }
  0x88   : > { %v250_v24 = vpop.permute.xlu0 %249  ;;  %v260_v33 = vpop.permute.xlu1 %259 }
  0x8c   : > { %v255_v28 = vpop.permute.xlu0 %254  ;;  %v265_v44 = vpop.permute.xlu1 %264 }
  0x90   : > { %v375_v58 = vpop.permute.xlu0 %374  ;;  %v380_v62 = vpop.permute.xlu1 %379 }
  0x94   : > { %v385_v10 = vpop.permute.xlu0 %384  ;;  %v390_v15 = vpop.permute.xlu1 %389 }
  0xed   : > { %v333_v25 = vpop.f32.mrb[0].mxu0 }
  0xee   : > { %v334_v26 = vadd.f32 %v333_v25, %v250_v24  ;;  %v335_v27 = vpop.f32.mrb[1].mxu0 }
  0xef   : > { %v336_v29 = vadd.f32 %v335_v27, %v250_v24  ;;  %v337_v30 = vpop.f32.mrb[2].mxu0  ;;  %v788_v27 = vld [vmem:[%s959_s2 + $0x10] sm:$0xff]  }
  0xf0   : > { %v338_v31 = vadd.f32 %v337_v30, %v255_v28  ;;  %v339_v32 = vpop.f32.mrb[3].mxu0  ;;  %v352_v35 = vmax.f32 %v334_v26, 0.0 }
  0xf1   : > { %v340_v34 = vadd.f32 %v339_v32, %v255_v28  ;;  %v353_v37 = vmax.f32 %v336_v29, 0.0  ;;  %v789_v28 = vld [vmem:[%s959_s2 + $0x18] sm:$0xff]   ;;  %v485_v29 = vpop.permute.xlu0 %484 }
  0xf2   : > { %v354_v36 = vmax.f32 %v338_v31, 0.0 }
  0xf3   : > { %v355_v38 = vmax.f32 %v340_v34, 0.0 }
  0xf4   : > { %v364_v39 = vpack.c.bf16 %v354_v36, %v352_v35 }
  0xf5   : > { %v343_v40 = vpop.f32.mrb[4].mxu0  ;;  %v365_v41 = vpack.c.bf16 %v355_v38, %v353_v37 }
  0xf6   : > { %v344_v42 = vadd.f32 %v343_v40, %v260_v33  ;;  %v345_v43 = vpop.f32.mrb[5].mxu0 }
  0xf7   : > { %v346_v45 = vadd.f32 %v345_v43, %v260_v33  ;;  %v347_v46 = vpop.f32.mrb[6].mxu0  ;;  %409 = vmatprep.subr.bf16.mxu1 %v365_v41  ;;  %v490_v33 = vpop.permute.xlu1 %489 }
  0xf8   : > { %v348_v47 = vadd.f32 %v347_v46, %v265_v44  ;;  %v349_v48 = vpop.f32.mrb[7].mxu0  ;;  %410 = vmatpush1.bf16.msra.mxu1 %v364_v39  ;;  %v356_v50 = vmax.f32 %v344_v42, 0.0  ;;  %v495_v43 = vpop.permute.xlu0 %494 }
  0xf9   : > { %v350_v49 = vadd.f32 %v349_v48, %v265_v44  ;;  %v357_v52 = vmax.f32 %v346_v45, 0.0 }
  0xfa   : > { %v358_v51 = vmax.f32 %v348_v47, 0.0 }
  0xfb   : > { %v359_v53 = vmax.f32 %v350_v49, 0.0  ;;  %v500_v48 = vpop.permute.xlu1 %499 }
  0xfc   : > { %v366_v54 = vpack.c.bf16 %v358_v51, %v356_v50 }
  0xfd   : > { %v367_v55 = vpack.c.bf16 %v359_v53, %v357_v52 }
  0xff   : > { %411 = vmatprep.subr.bf16.mxu1 %v367_v55 }
 0x100   : > { %412 = vmatpush1.bf16.msra.mxu1 %v366_v54 }
 0x103   : > { %743 = vmatmul.mubr.msk.bf16.vlgmr.msra.gmra.mrb[0].mxu1 %vm402_vm3, %v786_v56 }
 0x104   : > { %451 = vmatprep.mubr.bf16.mxu1 %v814_v0 }
 0x10b   : > { %744 = vmatmul.mubr.msk.bf16.gmra.mrb[4].mxu1 %vm402_vm3, %v787_v57 }
 0x10c   : > { %625 = vmatprep.mubr.bf16.mxu1 %v814_v0 }
 0x1d6   : > { %v443_v59 = vpop.f32.mrb[0].mxu1 }
 0x1d7   : > { %v444_v60 = vadd.f32 %v443_v59, %v375_v58  ;;  %v445_v61 = vpop.f32.mrb[1].mxu1 }
 0x1d8   : > { %v446_v63 = vadd.f32 %v445_v61, %v375_v58  ;;  %v447_v1 = vpop.f32.mrb[2].mxu1  ;;  %v588_v61 = vpop.permute.xlu0 %587 }
 0x1d9   : > { %v448_v2 = vadd.f32 %v447_v1, %v380_v62  ;;  %v449_v3 = vpop.f32.mrb[3].mxu1  ;;  %v462_v5 = vmax.f32 %v444_v60, 0.0  ;;  %v579_v60 = vld [vmem:[%s959_s2 + $0x20] sm:$0x3] }
 0x1da   : > { %v450_v4 = vadd.f32 %v449_v3, %v380_v62  ;;  %v463_v7 = vmax.f32 %v446_v63, 0.0 }
 0x1db   : > { %v464_v6 = vmax.f32 %v448_v2, 0.0 }
 0x1dc   : > { %v465_v8 = vmax.f32 %v450_v4, 0.0 }
 0x1dd   : > { %v474_v9 = vpack.c.bf16 %v464_v6, %v462_v5 }
 0x1de   : > { %v475_v11 = vpack.c.bf16 %v465_v8, %v463_v7  ;;  %v453_v12 = vpop.f32.mrb[4].mxu1 }
 0x1df   : > { %v454_v13 = vadd.f32 %v453_v12, %v385_v10  ;;  %v455_v14 = vpop.f32.mrb[5].mxu1 }
 0x1e0   : > { %v456_v16 = vadd.f32 %v455_v14, %v385_v10  ;;  %v457_v17 = vpop.f32.mrb[6].mxu1  ;;  %518 = vmatprep.subr.bf16.mxu0 %v475_v11 }
 0x1e1   : > { %v458_v18 = vadd.f32 %v457_v17, %v390_v15  ;;  %v459_v19 = vpop.f32.mrb[7].mxu1  ;;  %519 = vmatpush1.bf16.msra.mxu0 %v474_v9  ;;  %v466_v21 = vmax.f32 %v454_v13, 0.0 }
 0x1e2   : > { %v460_v20 = vadd.f32 %v459_v19, %v390_v15  ;;  %v467_v23 = vmax.f32 %v456_v16, 0.0 }
 0x1e3   : > { %v468_v22 = vmax.f32 %v458_v18, 0.0 }
 0x1e4   : > { %v469_v24 = vmax.f32 %v460_v20, 0.0 }
 0x1e5   : > { %v476_v25 = vpack.c.bf16 %v468_v22, %v466_v21 }
 0x1e6   : > { %v477_v26 = vpack.c.bf16 %v469_v24, %v467_v23 }
 0x1e8   : > { %520 = vmatprep.subr.bf16.mxu0 %v477_v26 }
 0x1e9   : > { %521 = vmatpush1.bf16.msra.mxu0 %v476_v25 }
 0x1ec   : > { %747 = vmatmul.mubr.msk.bf16.vlgmr.msra.gmra.mrb[8].mxu0 %vm402_vm3, %v788_v27 }
 0x1ed   : > { %560 = vmatprep.mubr.bf16.mxu0 %v814_v0 }
 0x1f4   : > { %748 = vmatmul.mubr.msk.bf16.gmra.mrb[12].mxu0 %vm402_vm3, %v789_v28 }
 0x2bf   : > { %v552_v30 = vpop.f32.mrb[8].mxu0 }
 0x2c0   : > { %v553_v31 = vadd.f32 %v552_v30, %v485_v29  ;;  %v554_v32 = vpop.f32.mrb[9].mxu0 }
 0x2c1   : > { %v555_v34 = vadd.f32 %v554_v32, %v485_v29  ;;  %v556_v35 = vpop.f32.mrb[10].mxu0 }
 0x2c2   : > { %v557_v36 = vadd.f32 %v556_v35, %v490_v33  ;;  %v558_v37 = vpop.f32.mrb[11].mxu0  ;;  %v571_v39 = vmax.f32 %v553_v31, 0.0 }
 0x2c3   : > { %v559_v38 = vadd.f32 %v558_v37, %v490_v33  ;;  %v572_v41 = vmax.f32 %v555_v34, 0.0 }
 0x2c4   : > { %v573_v40 = vmax.f32 %v557_v36, 0.0 }
 0x2c5   : > { %v574_v0 = vmax.f32 %v559_v38, 0.0 }
 0x2c6   : > { %v580_v42 = vpack.c.bf16 %v573_v40, %v571_v39 }
 0x2c7   : > { %v581_v44 = vpack.c.bf16 %v574_v0, %v572_v41  ;;  %v562_v45 = vpop.f32.mrb[12].mxu0 }
 0x2c8   : > { %v563_v46 = vadd.f32 %v562_v45, %v495_v43  ;;  %v564_v47 = vpop.f32.mrb[13].mxu0 }
 0x2c9   : > { %v565_v49 = vadd.f32 %v564_v47, %v495_v43  ;;  %v566_v50 = vpop.f32.mrb[14].mxu0  ;;  %593 = vmatprep.subr.bf16.mxu1 %v581_v44 }
 0x2ca   : > { %v567_v51 = vadd.f32 %v566_v50, %v500_v48  ;;  %v568_v52 = vpop.f32.mrb[15].mxu0  ;;  %594 = vmatpush1.bf16.msra.mxu1 %v580_v42  ;;  %v575_v54 = vmax.f32 %v563_v46, 0.0 }
 0x2cb   : > { %v569_v53 = vadd.f32 %v568_v52, %v500_v48  ;;  %v576_v56 = vmax.f32 %v565_v49, 0.0 }
 0x2cc   : > { %v577_v55 = vmax.f32 %v567_v51, 0.0 }
 0x2cd   : > { %v578_v57 = vmax.f32 %v569_v53, 0.0 }
 0x2ce   : > { %v582_v58 = vpack.c.bf16 %v577_v55, %v575_v54 }
 0x2cf   : > { %v583_v59 = vpack.c.bf16 %v578_v57, %v576_v56 }
 0x2d1   : > { %595 = vmatprep.subr.bf16.mxu1 %v583_v59 }
 0x2d2   : > { %596 = vmatpush1.bf16.msra.mxu1 %v582_v58 }
 0x2d5   : > { %749 = vmatmul.mubr.msk.bf16.vlgmr.msra.gmra.mrb[8].mxu1 %vm402_vm3, %v579_v60 }
 0x3a8   : > { %v627_v62 = vpop.f32.mrb[8].mxu1 }
 0x3a9   : > { %v628_v63 = vadd.f32 %v627_v62, %v588_v61  ;;  %v629_v1 = vpop.f32.mrb[9].mxu1 }
 0x3aa   : > { %v630_v2 = vadd.f32 %v629_v1, %v588_v61  ;;  %v631_v3 = vpop.f32.mrb[10].mxu1 }
 0x3ab   : > { %v632_v4 = vpop.f32.mrb[11].mxu1 }
 0x3ac   : > { %v636_v5 = vcombine.low %v628_v63, %v630_v2 }
 0x3ae   : > { %638 = vst [vmem:[%s235_s23] sm:$0x77] %v636_v5 }
 0x3af PF: > { %s14_s17 = sadd.s32 1, %s812_s17   ;;  %s962_s15 = smov %s808_s16 }
 0x3b0   : > { %p11_p5 = scmp.ge.s32.totalorder %s14_s17, 4   ;;  %s963_s16 = smov %s965_s18 }
 0x3b2   :  { %13 = sbr.rel (!%p11_p5) target bundleno = 2 (0x2), region = 66 }

</bundles_post_ra>
